<compile_context>
chip_gen: v5e
topology: v5e:2x2
jax: 0.10.0
libtpu: 0.0.40
codegen_flags: <defaults>
</compile_context>

<pallas_src>
import functools

import jax
import jax.numpy as jnp
from jax import lax
from jax.experimental import pallas as pl
from jax.experimental.pallas import tpu as pltpu


# ----------------------------------------------------------------------------
# VMEM budgeting (generation-aware).
# ----------------------------------------------------------------------------
_VMEM_HEADROOM = 8 * 1024 * 1024


def _vmem_capacity_bytes():
    """Physical VMEM per TensorCore; conservative 64 MiB fallback (v7x size)."""
    try:
        info = pltpu.get_tpu_info()
        for attr in ("vmem_capacity_bytes", "vmem_size_bytes", "vmem_bytes"):
            val = getattr(info, attr, None)
            if val:
                return int(val)
    except Exception:
        pass
    return 64 * 1024 * 1024


def _vmem_limit_bytes():
    return int(max(_vmem_capacity_bytes() - _VMEM_HEADROOM, 16 * 1024 * 1024))


def _mmd_tiling(b, d, itemsize, budget):
    """Row-block size and padded batch for the MMD kernel."""
    def est(tb):
        # 4 inputs x 2 pipeline buffers of (tb, d) + f32 (tb, tb) temporaries.
        return 8 * tb * d * itemsize + 10 * tb * tb * 4 + (1 << 20)

    for tb in (256, 128):                       # MXU-friendly, divides b: no padding
        if b % tb == 0 and est(tb) <= budget:
            return tb, b
    if b < 128 or (b <= 512 and est(b) <= budget):
        return b, b                             # single full-extent block
    # Pad to a lane-aligned tile (128 min so the (1, tb) norm blocks stay legal).
    tb = 256 if est(256) <= budget else 128
    return tb, -(-b // tb) * tb


def _coral_tiling(d, ns, nt, itemsize, budget):
    """Column-block size and padded feature width for the CORAL kernel."""
    nmax = max(ns, nt)

    def est(td):
        # 4 inputs x 2 buffers + 4 centered f32 copies + (td, td) f32 temporaries.
        return 8 * nmax * td * itemsize + 4 * nmax * td * 4 + 6 * td * td * 4 + (1 << 20)

    for td in (256, 128):
        if d % td == 0 and est(td) <= budget:
            return td, d
    if d < 128 or (d <= 512 and est(d) <= budget):
        return d, d
    td = 256 if est(256) <= budget else 128
    return td, -(-d // td) * td


def _tri_pairs(nblocks):
    """Upper-triangular block pairs (2, npairs) and their multiplicity weights."""
    ii, jj, ww = [], [], []
    for i in range(nblocks):
        for j in range(i, nblocks):
            ii.append(i)
            jj.append(j)
            ww.append(1.0 if i == j else 2.0)
    pairs = jnp.asarray([ii, jj], dtype=jnp.int32)   # long axis last (SMEM padding)
    weights = jnp.asarray(ww, dtype=jnp.float32)
    return pairs, weights


# ----------------------------------------------------------------------------
# MMD (multi-bandwidth Gaussian kernel) — matches MMDLoss.forward with
# kernel_type='rbf', kernel_mul=2.0, kernel_num=5, fix_sigma=None.
# ----------------------------------------------------------------------------
def _mmd_rbf_kernel(pairs_ref, invbw_ref, si_ref, sj_ref, ti_ref, tj_ref,
                    sqsi_ref, sqsj_ref, sqti_ref, sqtj_ref, out_ref, *,
                    kernel_mul, kernel_num, use_squaring, tb, b_real, masked):
    inv_bw0 = invbw_ref[0, 0]                     # 1 / base bandwidth (SMEM scalar)

    mask = None
    if masked:
        # Zero-padded tail rows: build a validity mask from the block indices.
        p = pl.program_id(0)
        i_blk = pairs_ref[0, p]
        j_blk = pairs_ref[1, p]
        row_g = i_blk * tb + lax.broadcasted_iota(jnp.int32, (tb, 1), 0)
        col_g = j_blk * tb + lax.broadcasted_iota(jnp.int32, (1, tb), 1)
        mask = jnp.logical_and(row_g < b_real, col_g < b_real).astype(jnp.float32)

    # Exponent scale of the *coarsest* (largest) bandwidth; finer bandwidths are
    # reached by repeated squaring when kernel_mul == 2 (one exp per quadrant).
    neg_coarsest = inv_bw0 * (-float(kernel_mul ** (-(kernel_num - 1))))
    neg_base = -inv_bw0

    def quadrant_sum(x_i, x_j, sq_i, sq_j):
        # A @ B^T on the MXU, contracting the feature axis of both operands
        # (no materialized transpose, operands kept in their original dtype).
        gram = lax.dot_general(x_i, x_j, (((1,), (1,)), ((), ())),
                               preferred_element_type=jnp.float32)        # (tb, tb)
        d2 = jnp.maximum(sq_i + sq_j - 2.0 * gram, 0.0)
        if use_squaring:
            e = jnp.exp(d2 * neg_coarsest)
            k = e
            for _ in range(kernel_num - 1):
                e = e * e                    # next (finer) bandwidth: exponent doubles
                k = k + e
        else:
            k = jnp.zeros_like(d2)
            for m in range(kernel_num):
                k = k + jnp.exp(d2 * (neg_base * float(kernel_mul ** (-m))))
        if mask is not None:
            k = k * mask
        return jnp.sum(k)

    s_i = si_ref[...]
    s_j = sj_ref[...]
    t_i = ti_ref[...]
    t_j = tj_ref[...]
    ss = quadrant_sum(s_i, s_j, sqsi_ref[...], sqsj_ref[...])
    tt = quadrant_sum(t_i, t_j, sqti_ref[...], sqtj_ref[...])
    st = quadrant_sum(s_i, t_j, sqsi_ref[...], sqtj_ref[...])
    ts = quadrant_sum(t_i, s_j, sqti_ref[...], sqsj_ref[...])

    # Pair multiplicity (triangular symmetry) and 1/b^2 are applied in the wrapper.
    out_ref[...] = ((ss + tt) - (st + ts)).reshape(out_ref.shape)


def mmd_loss(source, target, kernel_mul=2.0, kernel_num=5, fix_sigma=None):
    assert source.ndim == 2 and source.shape == target.shape, (
        "MMDLoss expects source/target feature matrices of identical shape")
    b, d = source.shape
    n = 2 * b

    s32 = source.astype(jnp.float32)
    t32 = target.astype(jnp.float32)

    # Row squared norms (O(nD)) — reused by every grid step instead of being
    # recomputed (and transposed) per block inside the kernel.
    sq_s = jnp.sum(s32 * s32, axis=-1, keepdims=True)            # (b, 1)
    sq_t = jnp.sum(t32 * t32, axis=-1, keepdims=True)            # (b, 1)

    # Bandwidth: sum of all pairwise squared distances over [source; target] via
    # the mean-centered closed form (translation invariant -> no cancellation).
    if fix_sigma is not None:
        bandwidth = jnp.asarray(fix_sigma, dtype=jnp.float32)
    else:
        mean_vec = (jnp.sum(s32, axis=0) + jnp.sum(t32, axis=0)) / jnp.float32(n)
        sc = s32 - mean_vec
        tc = t32 - mean_vec
        sumsq_c = jnp.sum(sc * sc) + jnp.sum(tc * tc)
        resid = jnp.sum(sc, axis=0) + jnp.sum(tc, axis=0)        # ~0, rounding only
        pair_sum = jnp.maximum(2.0 * n * sumsq_c - 2.0 * jnp.dot(resid, resid), 0.0)
        bandwidth = pair_sum / jnp.float32(n * n - n)
    bw0 = bandwidth / jnp.float32(kernel_mul ** (kernel_num // 2))
    inv_bw0 = jnp.reshape(1.0 / bw0, (1, 1)).astype(jnp.float32)  # precomputed reciprocal

    limit = _vmem_limit_bytes()
    tb, b_pad = _mmd_tiling(b, d, source.dtype.itemsize, int(0.85 * limit))
    masked = b_pad != b
    if masked:
        rpad = ((0, b_pad - b), (0, 0))
        src_k = jnp.pad(source, rpad)
        tgt_k = jnp.pad(target, rpad)
        sq_s = jnp.pad(sq_s, rpad)
        sq_t = jnp.pad(sq_t, rpad)
    else:
        src_k, tgt_k = source, target
    sq_s_row = jnp.reshape(sq_s, (1, b_pad))
    sq_t_row = jnp.reshape(sq_t, (1, b_pad))

    nb = b_pad // tb
    pairs, pair_w = _tri_pairs(nb)                 # (2, npairs), (npairs,)
    npairs = int(pair_w.shape[0])

    kern = functools.partial(
        _mmd_rbf_kernel,
        kernel_mul=float(kernel_mul),
        kernel_num=int(kernel_num),
        use_squaring=(float(kernel_mul) == 2.0),
        tb=int(tb),
        b_real=int(b),
        masked=bool(masked),
    )

    row_blk = lambda p, pr: (pr[0, p], 0)          # data / column-norm blocks (block i)
    col_blk = lambda p, pr: (pr[1, p], 0)          # data blocks (block j)
    col_sq = lambda p, pr: (0, pr[1, p])           # row-shaped norms (block j)

    partials = pl.pallas_call(
        kern,
        out_shape=jax.ShapeDtypeStruct((npairs, 1, 1), jnp.float32),
        grid_spec=pltpu.PrefetchScalarGridSpec(
            num_scalar_prefetch=1,
            grid=(npairs,),
            in_specs=[
                pl.BlockSpec(memory_space=pltpu.MemorySpace.SMEM),   # 1 / bw0
                pl.BlockSpec((tb, d), row_blk),                      # source rows, block i
                pl.BlockSpec((tb, d), col_blk),                      # source rows, block j
                pl.BlockSpec((tb, d), row_blk),                      # target rows, block i
                pl.BlockSpec((tb, d), col_blk),                      # target rows, block j
                pl.BlockSpec((tb, 1), row_blk),                      # ||s||^2, block i
                pl.BlockSpec((1, tb), col_sq),                       # ||s||^2, block j
                pl.BlockSpec((tb, 1), row_blk),                      # ||t||^2, block i
                pl.BlockSpec((1, tb), col_sq),                       # ||t||^2, block j
            ],
            out_specs=pl.BlockSpec((1, 1, 1), lambda p, pr: (p, 0, 0)),
        ),
        compiler_params=pltpu.CompilerParams(
            dimension_semantics=("parallel",),       # v7x: split pairs across both TCs
            vmem_limit_bytes=limit),
    )(pairs, inv_bw0, src_k, src_k, tgt_k, tgt_k, sq_s, sq_s_row, sq_t, sq_t_row)

    # Triangular symmetry: off-diagonal block pairs count twice; normalize by b^2.
    return jnp.sum(partials[:, 0, 0] * pair_w) / jnp.float32(b * b)


# ----------------------------------------------------------------------------
# CORAL — Frobenius distance between source/target feature covariances.
# ----------------------------------------------------------------------------
def _coral_kernel(pairs_ref, si_ref, sj_ref, ti_ref, tj_ref,
                  msi_ref, msj_ref, mti_ref, mtj_ref, out_ref, *,
                  inv_ns1, inv_nt1):
    # Column centering with globally precomputed means (correct under any column
    # tiling; removes four per-step sublane reductions).
    s_i = si_ref[...].astype(jnp.float32) - msi_ref[...]
    s_j = sj_ref[...].astype(jnp.float32) - msj_ref[...]
    t_i = ti_ref[...].astype(jnp.float32) - mti_ref[...]
    t_j = tj_ref[...].astype(jnp.float32) - mtj_ref[...]

    # Contract the sample axis directly — no materialized transpose.
    cdims = (((0,), (0,)), ((), ()))
    xc = lax.dot_general(s_i, s_j, cdims, preferred_element_type=jnp.float32) * inv_ns1
    xct = lax.dot_general(t_i, t_j, cdims, preferred_element_type=jnp.float32) * inv_nt1
    diff = xc - xct
    out_ref[...] = jnp.sum(diff * diff).reshape(out_ref.shape)


def coral_loss(source, target):
    assert source.ndim == 2 and target.ndim == 2 and source.shape[1] == target.shape[1]
    ns, d = source.shape
    nt = target.shape[0]
    assert ns >= 2 and nt >= 2, "CORAL needs at least 2 samples per domain"

    mean_s = jnp.mean(source.astype(jnp.float32), axis=0, keepdims=True)   # (1, d)
    mean_t = jnp.mean(target.astype(jnp.float32), axis=0, keepdims=True)

    limit = _vmem_limit_bytes()
    td, d_pad = _coral_tiling(d, ns, nt, source.dtype.itemsize, int(0.85 * limit))
    if d_pad != d:
        # Zero-padded columns have zero mean and zero centered values, so they
        # contribute exactly 0 to both covariances — no masking needed.
        cpad = ((0, 0), (0, d_pad - d))
        src_k = jnp.pad(source, cpad)
        tgt_k = jnp.pad(target, cpad)
        mean_s = jnp.pad(mean_s, cpad)
        mean_t = jnp.pad(mean_t, cpad)
    else:
        src_k, tgt_k = source, target

    nd = d_pad // td
    pairs, pair_w = _tri_pairs(nd)
    npairs = int(pair_w.shape[0])

    blk_i = lambda p, pr: (0, pr[0, p])
    blk_j = lambda p, pr: (0, pr[1, p])

    # TODO(synk): tile the sample axis (accumulate partial covariances in a
    # (td, td) scratch) when max(ns, nt) * td stops fitting v7x's 64 MiB VMEM.
    partials = pl.pallas_call(
        functools.partial(_coral_kernel,
                          inv_ns1=1.0 / float(ns - 1), inv_nt1=1.0 / float(nt - 1)),
        out_shape=jax.ShapeDtypeStruct((npairs, 1, 1), jnp.float32),
        grid_spec=pltpu.PrefetchScalarGridSpec(
            num_scalar_prefetch=1,
            grid=(npairs,),
            in_specs=[
                pl.BlockSpec((ns, td), blk_i),    # source columns, block i
                pl.BlockSpec((ns, td), blk_j),    # source columns, block j
                pl.BlockSpec((nt, td), blk_i),    # target columns, block i
                pl.BlockSpec((nt, td), blk_j),    # target columns, block j
                pl.BlockSpec((1, td), blk_i),     # source column means, block i
                pl.BlockSpec((1, td), blk_j),     # source column means, block j
                pl.BlockSpec((1, td), blk_i),     # target column means, block i
                pl.BlockSpec((1, td), blk_j),     # target column means, block j
            ],
            out_specs=pl.BlockSpec((1, 1, 1), lambda p, pr: (p, 0, 0)),
        ),
        compiler_params=pltpu.CompilerParams(
            dimension_semantics=("parallel",),
            vmem_limit_bytes=limit),
    )(pairs, src_k, src_k, tgt_k, tgt_k, mean_s, mean_s, mean_t, mean_t)

    return jnp.sum(partials[:, 0, 0] * pair_w) / jnp.float32(4 * d * d)


# ----------------------------------------------------------------------------
# TransferLoss dispatcher (mirrors the PyTorch module).
# ----------------------------------------------------------------------------
class TransferLoss:
    def __init__(self, loss_type="mmd", **kwargs):
        self.loss_type = loss_type
        if loss_type == "mmd":
            self.loss_func = functools.partial(mmd_loss, **kwargs)
        elif loss_type == "coral":
            self.loss_func = coral_loss
        else:
            # TODO(synk): lmmd/adv/daan/bnm/spd_mmd/lem/jeffrey need labels or
            # auxiliary trainable networks — fall back to 0 like the reference warning path.
            print("WARNING: No valid transfer loss function is used.")
            self.loss_func = lambda x, y, **kw: jnp.float32(0.0)

    def __call__(self, source, target, **kwargs):
        return self.loss_func(source, target, **kwargs)


# ----------------------------------------------------------------------------
# Pure-JAX references (numeric verification only).
# ----------------------------------------------------------------------------
def _mmd_ref(source, target, kernel_mul=2.0, kernel_num=5, fix_sigma=None):
    b = source.shape[0]
    total = jnp.concatenate([source, target], axis=0).astype(jnp.float32)
    n = total.shape[0]
    sq = jnp.sum(total * total, axis=-1)
    gram = jnp.matmul(total, total.T, precision=lax.Precision.HIGHEST)
    d2 = jnp.maximum(sq[:, None] + sq[None, :] - 2.0 * gram, 0.0)
    bw = fix_sigma if fix_sigma is not None else jnp.sum(d2) / (n * n - n)
    bw = bw / (kernel_mul ** (kernel_num // 2))
    kern = sum(jnp.exp(-d2 / (bw * kernel_mul ** m)) for m in range(kernel_num))
    xx = jnp.mean(kern[:b, :b])
    yy = jnp.mean(kern[b:, b:])
    xy = jnp.mean(kern[:b, b:])
    yx = jnp.mean(kern[b:, :b])
    return xx + yy - xy - yx


def _coral_ref(source, target):
    ns, d = source.shape
    nt = target.shape[0]
    hp = lax.Precision.HIGHEST
    xm = jnp.mean(source, 0, keepdims=True) - source
    xc = jnp.matmul(xm.T, xm, precision=hp) / (ns - 1)
    xmt = jnp.mean(target, 0, keepdims=True) - target
    xct = jnp.matmul(xmt.T, xmt, precision=hp) / (nt - 1)
    return jnp.sum((xc - xct) ** 2) / (4 * d * d)


if __name__ == "__main__":
    key = jax.random.PRNGKey(0)
    k1, k2, k3, k4, k5, k6 = jax.random.split(key, 6)

    mmd = TransferLoss("mmd")
    coral = TransferLoss("coral")

    # Small shapes (typical module usage): single full-extent block, one pair.
    B, D = 8, 32
    src_s = jax.random.normal(k1, (B, D), dtype=jnp.float32)
    tgt_s = jax.random.normal(k2, (B, D), dtype=jnp.float32) + 0.5

    out_m = jax.block_until_ready(mmd(src_s, tgt_s))
    ref_m = _mmd_ref(src_s, tgt_s)
    assert jnp.allclose(out_m, ref_m, rtol=1e-3, atol=1e-5), (out_m, ref_m)

    out_c = jax.block_until_ready(coral(src_s, tgt_s))
    ref_c = _coral_ref(src_s, tgt_s)
    assert jnp.allclose(out_c, ref_c, rtol=1e-3, atol=1e-6), (out_c, ref_c)

    # Aligned larger shapes: triangular multi-pair grid (3 blocks -> 6 pairs).
    B2, D2 = 384, 384
    src_l = jax.random.normal(k3, (B2, D2), dtype=jnp.float32)
    tgt_l = jax.random.normal(k4, (B2, D2), dtype=jnp.float32) + 0.25

    out_m2 = jax.block_until_ready(mmd(src_l, tgt_l))
    ref_m2 = _mmd_ref(src_l, tgt_l)
    assert jnp.allclose(out_m2, ref_m2, rtol=3e-3, atol=1e-5), (out_m2, ref_m2)

    out_c2 = jax.block_until_ready(coral(src_l, tgt_l))
    ref_c2 = _coral_ref(src_l, tgt_l)
    assert jnp.allclose(out_c2, ref_c2, rtol=3e-3, atol=1e-5), (out_c2, ref_c2)

    # Ragged shapes: zero-pad + mask path (MMD) and zero-padded columns (CORAL).
    B3, D3 = 600, 72
    src_r = jax.random.normal(k5, (B3, D3), dtype=jnp.float32)
    tgt_r = jax.random.normal(k6, (B3, D3), dtype=jnp.float32) - 0.3
    out_m3 = jax.block_until_ready(mmd(src_r, tgt_r))
    ref_m3 = _mmd_ref(src_r, tgt_r)
    assert jnp.allclose(out_m3, ref_m3, rtol=3e-3, atol=1e-5), (out_m3, ref_m3)

    NC, DC = 64, 600
    src_c = jax.random.normal(k5, (NC, DC), dtype=jnp.float32)
    tgt_c = jax.random.normal(k6, (NC, DC), dtype=jnp.float32) * 1.1 + 0.2
    out_c3 = jax.block_until_ready(coral(src_c, tgt_c))
    ref_c3 = _coral_ref(src_c, tgt_c)
    assert jnp.allclose(out_c3, ref_c3, rtol=3e-3, atol=1e-6), (out_c3, ref_c3)

    print("KERNEL_OK")
</pallas_src>

<mosaic_0001>
module attributes {stable_mosaic.version = 11 : i64} {
  func.func @_mmd_rbf_kernel(%arg0: i32, %arg1: memref<2x1xi32, #tpu.memory_space<smem>>, %arg2: memref<1x1xf32, #tpu.memory_space<smem>>, %arg3: memref<8x32xf32, #tpu.memory_space<vmem>>, %arg4: memref<8x32xf32, #tpu.memory_space<vmem>>, %arg5: memref<8x32xf32, #tpu.memory_space<vmem>>, %arg6: memref<8x32xf32, #tpu.memory_space<vmem>>, %arg7: memref<8x1xf32, #tpu.memory_space<vmem>>, %arg8: memref<1x8xf32, #tpu.memory_space<vmem>>, %arg9: memref<8x1xf32, #tpu.memory_space<vmem>>, %arg10: memref<1x8xf32, #tpu.memory_space<vmem>>, %arg11: memref<1x1x1xf32, #tpu.memory_space<vmem>>) attributes {dimension_semantics = [#tpu.dimension_semantics<parallel>], iteration_bounds = array<i64: 1>, scalar_prefetch = 1 : i64, scratch_operands = 0 : i64, tpu.core_type = #tpu.core_type<tc>, window_params = [{transform_indices = @transform_0, window_bounds = array<i64: 1, 1>}, {transform_indices = @transform_1, window_bounds = array<i64: 8, 32>}, {transform_indices = @transform_2, window_bounds = array<i64: 8, 32>}, {transform_indices = @transform_3, window_bounds = array<i64: 8, 32>}, {transform_indices = @transform_4, window_bounds = array<i64: 8, 32>}, {transform_indices = @transform_5, window_bounds = array<i64: 8, 1>}, {transform_indices = @transform_6, window_bounds = array<i64: 1, 8>}, {transform_indices = @transform_7, window_bounds = array<i64: 8, 1>}, {transform_indices = @transform_8, window_bounds = array<i64: 1, 8>}, {transform_indices = @transform_9, window_bounds = array<i64: 1, 1, 1>}]} {
    %c0 = arith.constant 0 : index
    %c0_0 = arith.constant 0 : index
    %0 = memref.load %arg2[%c0, %c0_0] : memref<1x1xf32, #tpu.memory_space<smem>>
    %cst = arith.constant -6.250000e-02 : f32
    %1 = arith.mulf %0, %cst : f32
    %c0_1 = arith.constant 0 : index
    %c0_2 = arith.constant 0 : index
    %2 = vector.load %arg3[%c0_1, %c0_2] : memref<8x32xf32, #tpu.memory_space<vmem>>, vector<8x32xf32>
    %c0_3 = arith.constant 0 : index
    %c0_4 = arith.constant 0 : index
    %3 = vector.load %arg4[%c0_3, %c0_4] : memref<8x32xf32, #tpu.memory_space<vmem>>, vector<8x32xf32>
    %c0_5 = arith.constant 0 : index
    %c0_6 = arith.constant 0 : index
    %4 = vector.load %arg5[%c0_5, %c0_6] : memref<8x32xf32, #tpu.memory_space<vmem>>, vector<8x32xf32>
    %c0_7 = arith.constant 0 : index
    %c0_8 = arith.constant 0 : index
    %5 = vector.load %arg6[%c0_7, %c0_8] : memref<8x32xf32, #tpu.memory_space<vmem>>, vector<8x32xf32>
    %c0_9 = arith.constant 0 : index
    %c0_10 = arith.constant 0 : index
    %6 = vector.load %arg7[%c0_9, %c0_10] : memref<8x1xf32, #tpu.memory_space<vmem>>, vector<8x1xf32>
    %c0_11 = arith.constant 0 : index
    %c0_12 = arith.constant 0 : index
    %7 = vector.load %arg8[%c0_11, %c0_12] : memref<1x8xf32, #tpu.memory_space<vmem>>, vector<1x8xf32>
    %cst_13 = arith.constant dense<0.000000e+00> : vector<8x8xf32>
    %8 = tpu.matmul %2, %3, %cst_13 {dimension_numbers = #tpu.dot_dimension_numbers<[1], [1], [0], [0], [0, 0, 1, 0], [], []>} : vector<8x32xf32>, vector<8x32xf32>, vector<8x8xf32> -> vector<8x8xf32>
    %9 = vector.broadcast %6 : vector<8x1xf32> to vector<8x8xf32>
    %10 = vector.broadcast %7 : vector<1x8xf32> to vector<8x8xf32>
    %11 = arith.addf %9, %10 : vector<8x8xf32>
    %cst_14 = arith.constant 2.000000e+00 : f32
    %12 = vector.broadcast %cst_14 : f32 to vector<8x8xf32>
    %13 = arith.mulf %12, %8 : vector<8x8xf32>
    %14 = arith.subf %11, %13 : vector<8x8xf32>
    %cst_15 = arith.constant 0.000000e+00 : f32
    %15 = vector.broadcast %cst_15 : f32 to vector<8x8xf32>
    %16 = arith.maximumf %14, %15 : vector<8x8xf32>
    %17 = vector.broadcast %1 : f32 to vector<8x8xf32>
    %18 = arith.mulf %16, %17 : vector<8x8xf32>
    %19 = math.exp %18 : vector<8x8xf32>
    %20 = arith.mulf %19, %19 : vector<8x8xf32>
    %21 = arith.addf %19, %20 : vector<8x8xf32>
    %22 = arith.mulf %20, %20 : vector<8x8xf32>
    %23 = arith.addf %21, %22 : vector<8x8xf32>
    %24 = arith.mulf %22, %22 : vector<8x8xf32>
    %25 = arith.addf %23, %24 : vector<8x8xf32>
    %26 = arith.mulf %24, %24 : vector<8x8xf32>
    %27 = arith.addf %25, %26 : vector<8x8xf32>
    %28 = vector.shape_cast %27 : vector<8x8xf32> to vector<1x8x8xf32>
    %cst_16 = arith.constant dense<0.000000e+00> : vector<1xf32>
    %29 = vector.multi_reduction <add>, %28, %cst_16 [1, 2] : vector<1x8x8xf32> to vector<1xf32>
    %30 = vector.shape_cast %29 : vector<1xf32> to vector<1x1x1xf32>
    %31 = vector.extract %30[0, 0, 0] : f32 from vector<1x1x1xf32>
    %c0_17 = arith.constant 0 : index
    %c0_18 = arith.constant 0 : index
    %32 = vector.load %arg9[%c0_17, %c0_18] : memref<8x1xf32, #tpu.memory_space<vmem>>, vector<8x1xf32>
    %c0_19 = arith.constant 0 : index
    %c0_20 = arith.constant 0 : index
    %33 = vector.load %arg10[%c0_19, %c0_20] : memref<1x8xf32, #tpu.memory_space<vmem>>, vector<1x8xf32>
    %cst_21 = arith.constant dense<0.000000e+00> : vector<8x8xf32>
    %34 = tpu.matmul %4, %5, %cst_21 {dimension_numbers = #tpu.dot_dimension_numbers<[1], [1], [0], [0], [0, 0, 1, 0], [], []>} : vector<8x32xf32>, vector<8x32xf32>, vector<8x8xf32> -> vector<8x8xf32>
    %35 = vector.broadcast %32 : vector<8x1xf32> to vector<8x8xf32>
    %36 = vector.broadcast %33 : vector<1x8xf32> to vector<8x8xf32>
    %37 = arith.addf %35, %36 : vector<8x8xf32>
    %cst_22 = arith.constant 2.000000e+00 : f32
    %38 = vector.broadcast %cst_22 : f32 to vector<8x8xf32>
    %39 = arith.mulf %38, %34 : vector<8x8xf32>
    %40 = arith.subf %37, %39 : vector<8x8xf32>
    %cst_23 = arith.constant 0.000000e+00 : f32
    %41 = vector.broadcast %cst_23 : f32 to vector<8x8xf32>
    %42 = arith.maximumf %40, %41 : vector<8x8xf32>
    %43 = vector.broadcast %1 : f32 to vector<8x8xf32>
    %44 = arith.mulf %42, %43 : vector<8x8xf32>
    %45 = math.exp %44 : vector<8x8xf32>
    %46 = arith.mulf %45, %45 : vector<8x8xf32>
    %47 = arith.addf %45, %46 : vector<8x8xf32>
    %48 = arith.mulf %46, %46 : vector<8x8xf32>
    %49 = arith.addf %47, %48 : vector<8x8xf32>
    %50 = arith.mulf %48, %48 : vector<8x8xf32>
    %51 = arith.addf %49, %50 : vector<8x8xf32>
    %52 = arith.mulf %50, %50 : vector<8x8xf32>
    %53 = arith.addf %51, %52 : vector<8x8xf32>
    %54 = vector.shape_cast %53 : vector<8x8xf32> to vector<1x8x8xf32>
    %cst_24 = arith.constant dense<0.000000e+00> : vector<1xf32>
    %55 = vector.multi_reduction <add>, %54, %cst_24 [1, 2] : vector<1x8x8xf32> to vector<1xf32>
    %56 = vector.shape_cast %55 : vector<1xf32> to vector<1x1x1xf32>
    %57 = vector.extract %56[0, 0, 0] : f32 from vector<1x1x1xf32>
    %c0_25 = arith.constant 0 : index
    %c0_26 = arith.constant 0 : index
    %58 = vector.load %arg7[%c0_25, %c0_26] : memref<8x1xf32, #tpu.memory_space<vmem>>, vector<8x1xf32>
    %c0_27 = arith.constant 0 : index
    %c0_28 = arith.constant 0 : index
    %59 = vector.load %arg10[%c0_27, %c0_28] : memref<1x8xf32, #tpu.memory_space<vmem>>, vector<1x8xf32>
    %cst_29 = arith.constant dense<0.000000e+00> : vector<8x8xf32>
    %60 = tpu.matmul %2, %5, %cst_29 {dimension_numbers = #tpu.dot_dimension_numbers<[1], [1], [0], [0], [0, 0, 1, 0], [], []>} : vector<8x32xf32>, vector<8x32xf32>, vector<8x8xf32> -> vector<8x8xf32>
    %61 = vector.broadcast %58 : vector<8x1xf32> to vector<8x8xf32>
    %62 = vector.broadcast %59 : vector<1x8xf32> to vector<8x8xf32>
    %63 = arith.addf %61, %62 : vector<8x8xf32>
    %cst_30 = arith.constant 2.000000e+00 : f32
    %64 = vector.broadcast %cst_30 : f32 to vector<8x8xf32>
    %65 = arith.mulf %64, %60 : vector<8x8xf32>
    %66 = arith.subf %63, %65 : vector<8x8xf32>
    %cst_31 = arith.constant 0.000000e+00 : f32
    %67 = vector.broadcast %cst_31 : f32 to vector<8x8xf32>
    %68 = arith.maximumf %66, %67 : vector<8x8xf32>
    %69 = vector.broadcast %1 : f32 to vector<8x8xf32>
    %70 = arith.mulf %68, %69 : vector<8x8xf32>
    %71 = math.exp %70 : vector<8x8xf32>
    %72 = arith.mulf %71, %71 : vector<8x8xf32>
    %73 = arith.addf %71, %72 : vector<8x8xf32>
    %74 = arith.mulf %72, %72 : vector<8x8xf32>
    %75 = arith.addf %73, %74 : vector<8x8xf32>
    %76 = arith.mulf %74, %74 : vector<8x8xf32>
    %77 = arith.addf %75, %76 : vector<8x8xf32>
    %78 = arith.mulf %76, %76 : vector<8x8xf32>
    %79 = arith.addf %77, %78 : vector<8x8xf32>
    %80 = vector.shape_cast %79 : vector<8x8xf32> to vector<1x8x8xf32>
    %cst_32 = arith.constant dense<0.000000e+00> : vector<1xf32>
    %81 = vector.multi_reduction <add>, %80, %cst_32 [1, 2] : vector<1x8x8xf32> to vector<1xf32>
    %82 = vector.shape_cast %81 : vector<1xf32> to vector<1x1x1xf32>
    %83 = vector.extract %82[0, 0, 0] : f32 from vector<1x1x1xf32>
    %c0_33 = arith.constant 0 : index
    %c0_34 = arith.constant 0 : index
    %84 = vector.load %arg9[%c0_33, %c0_34] : memref<8x1xf32, #tpu.memory_space<vmem>>, vector<8x1xf32>
    %c0_35 = arith.constant 0 : index
    %c0_36 = arith.constant 0 : index
    %85 = vector.load %arg8[%c0_35, %c0_36] : memref<1x8xf32, #tpu.memory_space<vmem>>, vector<1x8xf32>
    %cst_37 = arith.constant dense<0.000000e+00> : vector<8x8xf32>
    %86 = tpu.matmul %4, %3, %cst_37 {dimension_numbers = #tpu.dot_dimension_numbers<[1], [1], [0], [0], [0, 0, 1, 0], [], []>} : vector<8x32xf32>, vector<8x32xf32>, vector<8x8xf32> -> vector<8x8xf32>
    %87 = vector.broadcast %84 : vector<8x1xf32> to vector<8x8xf32>
    %88 = vector.broadcast %85 : vector<1x8xf32> to vector<8x8xf32>
    %89 = arith.addf %87, %88 : vector<8x8xf32>
    %cst_38 = arith.constant 2.000000e+00 : f32
    %90 = vector.broadcast %cst_38 : f32 to vector<8x8xf32>
    %91 = arith.mulf %90, %86 : vector<8x8xf32>
    %92 = arith.subf %89, %91 : vector<8x8xf32>
    %cst_39 = arith.constant 0.000000e+00 : f32
    %93 = vector.broadcast %cst_39 : f32 to vector<8x8xf32>
    %94 = arith.maximumf %92, %93 : vector<8x8xf32>
    %95 = vector.broadcast %1 : f32 to vector<8x8xf32>
    %96 = arith.mulf %94, %95 : vector<8x8xf32>
    %97 = math.exp %96 : vector<8x8xf32>
    %98 = arith.mulf %97, %97 : vector<8x8xf32>
    %99 = arith.addf %97, %98 : vector<8x8xf32>
    %100 = arith.mulf %98, %98 : vector<8x8xf32>
    %101 = arith.addf %99, %100 : vector<8x8xf32>
    %102 = arith.mulf %100, %100 : vector<8x8xf32>
    %103 = arith.addf %101, %102 : vector<8x8xf32>
    %104 = arith.mulf %102, %102 : vector<8x8xf32>
    %105 = arith.addf %103, %104 : vector<8x8xf32>
    %106 = vector.shape_cast %105 : vector<8x8xf32> to vector<1x8x8xf32>
    %cst_40 = arith.constant dense<0.000000e+00> : vector<1xf32>
    %107 = vector.multi_reduction <add>, %106, %cst_40 [1, 2] : vector<1x8x8xf32> to vector<1xf32>
    %108 = vector.shape_cast %107 : vector<1xf32> to vector<1x1x1xf32>
    %109 = vector.extract %108[0, 0, 0] : f32 from vector<1x1x1xf32>
    %110 = arith.addf %31, %57 : f32
    %111 = arith.addf %83, %109 : f32
    %112 = arith.subf %110, %111 : f32
    %113 = vector.broadcast %112 : f32 to vector<1x1x1xf32>
    %c0_41 = arith.constant 0 : index
    %c0_42 = arith.constant 0 : index
    %c0_43 = arith.constant 0 : index
    %114 = vector.load %arg11[%c0_41, %c0_42, %c0_43] : memref<1x1x1xf32, #tpu.memory_space<vmem>>, vector<1x1x1xf32>
    tpu.vector_store %arg11[%c0_41, %c0_42, %c0_43], %113 {strides = array<i32>} : memref<1x1x1xf32, #tpu.memory_space<vmem>>, vector<1x1x1xf32>,
    return
  }
  func.func @transform_0(%arg0: i32, %arg1: memref<2x1xi32, #tpu.memory_space<smem>>) -> (i32, i32) {
    %c0_i32 = arith.constant 0 : i32
    %c0_i32_0 = arith.constant 0 : i32
    %c0_i32_1 = arith.constant 0 : i32
    return %c0_i32, %c0_i32_0 : i32, i32
  }
  func.func @transform_1(%arg0: i32, %arg1: memref<2x1xi32, #tpu.memory_space<smem>>) -> (i32, i32) {
    %c0 = arith.constant 0 : index
    %0 = arith.index_cast %arg0 : i32 to index
    %1 = memref.load %arg1[%c0, %0] : memref<2x1xi32, #tpu.memory_space<smem>>
    %c0_i32 = arith.constant 0 : i32
    %c0_i32_0 = arith.constant 0 : i32
    return %1, %c0_i32 : i32, i32
  }
  func.func @transform_2(%arg0: i32, %arg1: memref<2x1xi32, #tpu.memory_space<smem>>) -> (i32, i32) {
    %c1 = arith.constant 1 : index
    %0 = arith.index_cast %arg0 : i32 to index
    %1 = memref.load %arg1[%c1, %0] : memref<2x1xi32, #tpu.memory_space<smem>>
    %c0_i32 = arith.constant 0 : i32
    %c0_i32_0 = arith.constant 0 : i32
    return %1, %c0_i32 : i32, i32
  }
  func.func @transform_3(%arg0: i32, %arg1: memref<2x1xi32, #tpu.memory_space<smem>>) -> (i32, i32) {
    %c0 = arith.constant 0 : index
    %0 = arith.index_cast %arg0 : i32 to index
    %1 = memref.load %arg1[%c0, %0] : memref<2x1xi32, #tpu.memory_space<smem>>
    %c0_i32 = arith.constant 0 : i32
    %c0_i32_0 = arith.constant 0 : i32
    return %1, %c0_i32 : i32, i32
  }
  func.func @transform_4(%arg0: i32, %arg1: memref<2x1xi32, #tpu.memory_space<smem>>) -> (i32, i32) {
    %c1 = arith.constant 1 : index
    %0 = arith.index_cast %arg0 : i32 to index
    %1 = memref.load %arg1[%c1, %0] : memref<2x1xi32, #tpu.memory_space<smem>>
    %c0_i32 = arith.constant 0 : i32
    %c0_i32_0 = arith.constant 0 : i32
    return %1, %c0_i32 : i32, i32
  }
  func.func @transform_5(%arg0: i32, %arg1: memref<2x1xi32, #tpu.memory_space<smem>>) -> (i32, i32) {
    %c0 = arith.constant 0 : index
    %0 = arith.index_cast %arg0 : i32 to index
    %1 = memref.load %arg1[%c0, %0] : memref<2x1xi32, #tpu.memory_space<smem>>
    %c0_i32 = arith.constant 0 : i32
    %c0_i32_0 = arith.constant 0 : i32
    return %1, %c0_i32 : i32, i32
  }
  func.func @transform_6(%arg0: i32, %arg1: memref<2x1xi32, #tpu.memory_space<smem>>) -> (i32, i32) {
    %c1 = arith.constant 1 : index
    %0 = arith.index_cast %arg0 : i32 to index
    %1 = memref.load %arg1[%c1, %0] : memref<2x1xi32, #tpu.memory_space<smem>>
    %c0_i32 = arith.constant 0 : i32
    %c0_i32_0 = arith.constant 0 : i32
    return %c0_i32, %1 : i32, i32
  }
  func.func @transform_7(%arg0: i32, %arg1: memref<2x1xi32, #tpu.memory_space<smem>>) -> (i32, i32) {
    %c0 = arith.constant 0 : index
    %0 = arith.index_cast %arg0 : i32 to index
    %1 = memref.load %arg1[%c0, %0] : memref<2x1xi32, #tpu.memory_space<smem>>
    %c0_i32 = arith.constant 0 : i32
    %c0_i32_0 = arith.constant 0 : i32
    return %1, %c0_i32 : i32, i32
  }
  func.func @transform_8(%arg0: i32, %arg1: memref<2x1xi32, #tpu.memory_space<smem>>) -> (i32, i32) {
    %c1 = arith.constant 1 : index
    %0 = arith.index_cast %arg0 : i32 to index
    %1 = memref.load %arg1[%c1, %0] : memref<2x1xi32, #tpu.memory_space<smem>>
    %c0_i32 = arith.constant 0 : i32
    %c0_i32_0 = arith.constant 0 : i32
    return %c0_i32, %1 : i32, i32
  }
  func.func @transform_9(%arg0: i32, %arg1: memref<2x1xi32, #tpu.memory_space<smem>>) -> (i32, i32, i32) {
    %c0_i32 = arith.constant 0 : i32
    %c0_i32_0 = arith.constant 0 : i32
    %c0_i32_1 = arith.constant 0 : i32
    return %arg0, %c0_i32, %c0_i32_0 : i32, i32, i32
  }
}

</mosaic_0001>

<bundles_post_ra>
// kernel: tpu_custom_call.1
= control target key start
LH: loop header
LB: loop body
LE: loop exit
PB: predicated region body
PF: predicated region fallthrough
CT: control target
= control target key end

     0   :  { %s639_s16 = smov [#allocation3]   ;;  %s761_s0 = inlined_call_operand.vmem [shape: s32[2,1], index: 0, kind: input, shape index: {}]   ;;  %s762_s1 = inlined_call_operand.<no memory space> [shape: f32[1,1], index: 1, kind: input, shape index: {}]   ;;  %s763_s2 = inlined_call_operand.vmem [shape: f32[8,32], index: 2, kind: input, shape index: {}]   ;;  %s764_s3 = inlined_call_operand.vmem [shape: f32[8,32], index: 3, kind: input, shape index: {}]   ;;  %s765_s4 = inlined_call_operand.hbm [shape: f32[8,32], index: 4, kind: input, shape index: {}]   ;;  %s766_s5 = inlined_call_operand.hbm [shape: f32[8,32], index: 5, kind: input, shape index: {}]   ;;  %s767_s6 = inlined_call_operand.vmem [shape: f32[8,1], index: 6, kind: input, shape index: {}]   ;;  %s768_s7 = inlined_call_operand.vmem [shape: f32[1,8], index: 7, kind: input, shape index: {}]   ;;  %s769_s8 = inlined_call_operand.vmem [shape: f32[8,1], index: 8, kind: input, shape index: {}]   ;;  %s770_s9 = inlined_call_operand.vmem [shape: f32[1,8], index: 9, kind: input, shape index: {}]   ;;  %s771_s10 = inlined_call_operand.hbm [shape: f32[1,1,1], index: 10, kind: output, shape index: {}]  }
   0x1   :  { %s16_s15 = sshll.u32 %s761_s0, 4  ;;  %s17_s15 = int_to_ptr.vmem [resolvable:$true] %s16_s15 }
   0x2   :  { %19 = dma.vmem_to_smem %s17_s15, 32, %s639_s16, [#allocation2] }
   0x3   :  { %631 = dma.done.wait [#allocation2], 32 }
   0x4   :  { %632 = vsyncadd [#allocation2], 4294967264 }
   0x5   :  { %23 = sfence }
   0x6   :  { %24 = vsyncpa [#allocation6], 0 }
   0x7   :  { %25 = vsyncpa [#allocation9], 0 }
   0x8   :  { %26 = vsyncpa [#allocation7], 0  ;;  %s53_s17 = sld [smem:[#allocation3]]  ;;  %s640_s19 = smov [#allocation5]  }
   0x9   :  { %s506_s18 = sld [smem:[#allocation3 + $0x80]]  ;;  %s61_s20 = sshll.u32 %s640_s19, 4  ;;  %s62_s20 = int_to_ptr.vmem [resolvable:$true] %s61_s20 }
   0xa   :  { %s641_s21 = smov [#allocation8]   ;;  %s563_s16 = scalar_lea.hbm %s765_s4, 8 }
   0xb   :  { %s702_s22 = sshll.u32 %s641_s21, 4  ;;  %s79_s22 = int_to_ptr.vmem [resolvable:$true] %s702_s22 }
   0xe   :  { %s505_s23 = sshll.u32 %s53_s17, 3 }
   0xf   :  { %s57_s25 = scalar_lea.hbm %s765_s4, %s505_s23  ;;  %s507_s26 = sshll.u32 %s506_s18, 3 }
  0x10   :  { %s59_s27 = sshll.u32 %s57_s25, 4  ;;  %s74_s30 = scalar_lea.hbm %s766_s5, %s507_s26  ;;  %s60_s27 = int_to_ptr.hbm [resolvable:$true] %s59_s27 }
  0x11   :  { %s76_s11 = sshll.u32 %s74_s30, 4  ;;  %s559_s12 = sshra.s32 %s60_s27, 4  ;;  %s560_s12 = int_to_ptr.hbm [resolvable:$true] %s559_s12  ;;  %s77_s11 = int_to_ptr.hbm [resolvable:$true] %s76_s11 }
  0x12   :  { %s561_s13 = scalar_lea.hbm %s560_s12, 8  ;;  %p564_p1 = scmp.lt.s32.totalorder %s560_s12, %s765_s4 }
  0x13   :  { %p562_p0 = scmp.ne.s32.totalorder %s560_s12, %s561_s13  ;;  %p565_p2 = scmp.lt.s32.totalorder %s563_s16, %s561_s13 }
  0x15   :  { %p566_p3 = por %p565_p2, %p564_p1 }
  0x17   :  { %p567_p4 = pnand %p566_p3, %p562_p0 }
  0x19   :  { %570 = shalt.err (!%p567_p4)
}
  0x1a   :  { %64 = dma.hbm_to_vmem [thread:$0]  %s60_s27, 128, %s62_s20, [#allocation6]  }
  0x1b   :  { %s583_s18 = sshra.s32 %s77_s11, 4  ;;  %s587_s24 = scalar_lea.hbm %s766_s5, 8  ;;  %s584_s18 = int_to_ptr.hbm [resolvable:$true] %s583_s18 }
  0x1c   :  { %s585_s21 = scalar_lea.hbm %s584_s18, 8  ;;  %p588_p6 = scmp.lt.s32.totalorder %s584_s18, %s766_s5 }
  0x1d   :  { %p586_p5 = scmp.ne.s32.totalorder %s584_s18, %s585_s21  ;;  %p589_p7 = scmp.lt.s32.totalorder %s587_s24, %s585_s21 }
  0x1f   :  { %p590_p8 = por %p589_p7, %p588_p6 }
  0x21   :  { %p591_p9 = pnand %p590_p8, %p586_p5 }
  0x23   :  { %594 = shalt.err (!%p591_p9)
}
  0x24   :  { %81 = dma.hbm_to_vmem [thread:$0]  %s77_s11, 128, %s79_s22, [#allocation9]  }
  0x25   :  { %633 = dma.done.wait [#allocation6], 128  }
  0x26   :  { %634 = vsyncadd [#allocation6], 4294967168 }
  0x27   :  { %635 = dma.done.wait [#allocation9], 128  }
  0x28   :  { %636 = vsyncadd [#allocation9], 4294967168  ;;  %s509_s4 = sld [smem:[#allocation3 + $0x80]]  ;;  %v642_v0 = vmov 0   ;;  %vm234_vm0 = vcmask 261120   ;;  %v231_v1 = vld [vmem:[#allocation8] sm:$0xff] }
  0x29   :  { %536 = vset.pattern.permute.xlu0 %v642_v0  ;;  %s169_s20 = sld [smem:[#allocation3]]  ;;  %519 = vmatpush.xpose.msk.msra.mxu2 %vm234_vm0, %v231_v1  ;;  %v230_v2 = vld [vmem:[#allocation5] sm:$0xff]  ;;  %vm285_vm1 = vcmask 64512   ;;  %s643_s25 = smov [#allocation10]   ;;  %vm451_vm2 = vcmask 0  }
  0x2a   :  { %517 = vmatpush.xpose.msk.msra.mxu1 %vm234_vm0, %v231_v1  ;;  %s458_s26 = sshll.u32 %s643_s25, 4  ;;  %s459_s26 = int_to_ptr.vmem [resolvable:$true] %s458_s26 }
  0x2d   :  { %518 = vmatmul.msk.f32.vlgmr.msra.gmra.mxu1 %vm234_vm0, %v230_v2 }
  0x2e   :  { %p179_p10 = scmp.lt.s32.totalorder %s509_s4, 0 }
  0x2f   :  { %p170_p11 = scmp.lt.s32.totalorder %s169_s20, 0 }
  0x30   :  { %s773_s4 = smov (!%p179_p10, %s509_s4), 0 }
  0x31   :  { %s775_s20 = smov (!%p170_p11, %s169_s20), 0  ;;  %s510_s5 = sshll.u32 %s773_s4, 3 }
  0x32   :  { %s204_s28 = scalar_lea.vmem %s768_s7, %s773_s4  ;;  %s182_s11 = scalar_lea.vmem %s764_s3, %s510_s5 }
  0x33   :  { %s508_s12 = sshll.u32 %s775_s20, 3  ;;  %v229_v3 = vld [vmem:[%s182_s11] sm:$0xff]  ;;  %s221_s3 = scalar_lea.vmem %s770_s9, %s773_s4 }
  0x34   :  { %s173_s15 = scalar_lea.vmem %s763_s2, %s508_s12  ;;  %s196_s19 = scalar_lea.vmem %s767_s6, %s508_s12  ;;  %515 = vmatpush.xpose.msk.msra.mxu0 %vm234_vm0, %v229_v3  ;;  %521 = vmatpush.xpose.msk.msra.mxu3 %vm234_vm0, %v229_v3  ;;  %v538_v8 = vld [vmem:[%s221_s3] ss:$0 sm:$0xff] }
  0x35   :  { %v228_v4 = vld [vmem:[%s173_s15] sm:$0xff]  ;;  %s213_s6 = scalar_lea.vmem %s769_s8, %s508_s12  ;;  %s227_s9 = smul.f32 -0.0625, %s762_s1 }
  0x36   :  { %v232_v5 = vld [vmem:[%s196_s19] sm:$0xff]  ;;  %520 = vmatmul.msk.f32.vlgmr.msra.gmra.mxu2 %vm234_vm0, %v228_v4 }
  0x37   :  { %263 = vperm.xlu0 %536, %v232_v5   ;;  %516 = vmatmul.msk.f32.vlgmr.msra.gmra.mxu0 %vm234_vm0, %v228_v4  ;;  %v296_v6 = vld [vmem:[%s213_s6] sm:$0xff]  ;;  %v273_v16 = vstv %s227_s9 }
  0x38   :  { %522 = vmatmul.msk.f32.vlgmr.msra.gmra.mxu3 %vm234_vm0, %v230_v2  ;;  %v537_v10 = vld [vmem:[%s204_s28] ss:$0 sm:$0xff]  ;;  %s460_s28 = sshll.u32 %s771_s10, 4  ;;  %s461_s28 = int_to_ptr.hbm [resolvable:$true] %s460_s28 }
  0x3f   :  { %326 = vperm.xlu0 %536, %v296_v6  }
  0xa9   :  { %v264_v7 = vpop.permute.xlu0 %263 }
  0xaa   :  { %v321_v9 = vpop.f32.mrf.mxu1  ;;  %v269_v15 = vadd.f32 %v537_v10, %v264_v7  ;;  %v377_v21 = vadd.f32 %v538_v8, %v264_v7 }
  0xab   :  { %v333_v11 = vmul.f32 2.0, %v321_v9 }
  0xb1   :  { %v327_v12 = vpop.permute.xlu0 %326 }
  0xb2   :  { %v332_v13 = vadd.f32 %v538_v8, %v327_v12  ;;  %v422_v29 = vadd.f32 %v537_v10, %v327_v12 }
  0xb4   :  { %v334_v14 = vsub.f32 %v332_v13, %v333_v11  ;;  %v258_v17 = vpop.f32.mrf.mxu0 }
  0xb5   :  { %v270_v19 = vmul.f32 2.0, %v258_v17 }
  0xb6   :  { %v335_v18 = vmax.f32 %v334_v14, 0.0 }
  0xb7   :  { %v271_v22 = vsub.f32 %v269_v15, %v270_v19 }
  0xb8   :  { %v336_v20 = vmul.f32 %v335_v18, %v273_v16 }
  0xb9   :  { %v374_v24 = vpop.f32.mrf.mxu2  ;;  %v272_v25 = vmax.f32 %v271_v22, 0.0 }
  0xba   :  { %v337_v23 = vmul.f32 1.442695, %v336_v20  ;;  %v378_v26 = vmul.f32 2.0, %v374_v24 }
  0xbb   :  { %v419_v27 = vpop.f32.mrf.mxu3  ;;  %v274_v28 = vmul.f32 %v273_v16, %v272_v25 }
  0xbc   :  { %539 = vpow2.f32 %v337_v23  ;;  %v379_v30 = vsub.f32 %v377_v21, %v378_v26  ;;  %v423_v31 = vmul.f32 2.0, %v419_v27 }
  0xbd   :  { %v275_v32 = vmul.f32 1.442695, %v274_v28 }
  0xbe   :  { %v380_v33 = vmax.f32 %v379_v30, 0.0  ;;  %v424_v34 = vsub.f32 %v422_v29, %v423_v31 }
  0xbf   :  { %541 = vpow2.f32 %v275_v32 }
  0xc0   :  { %v381_v35 = vmul.f32 %v380_v33, %v273_v16  ;;  %v425_v36 = vmax.f32 %v424_v34, 0.0 }
  0xc2   :  { %v540_v37 = vpop.eup %539  ;;  %v382_v38 = vmul.f32 1.442695, %v381_v35  ;;  %v426_v39 = vmul.f32 %v425_v36, %v273_v16 }
  0xc3   :  { %v339_v41 = vmul.f32 %v540_v37, %v540_v37 }
  0xc4   :  { %543 = vpow2.f32 %v382_v38  ;;  %v427_v40 = vmul.f32 1.442695, %v426_v39 }
  0xc5   :  { %v542_v42 = vpop.eup %541  ;;  %v340_v44 = vadd.f32 %v540_v37, %v339_v41  ;;  %v341_v45 = vmul.f32 %v339_v41, %v339_v41 }
  0xc6   :  { %545 = vpow2.f32 %v427_v40  ;;  %v277_v43 = vmul.f32 %v542_v42, %v542_v42 }
  0xc7   :  { %v342_v53 = vadd.f32 %v341_v45, %v340_v44  ;;  %v343_v54 = vmul.f32 %v341_v45, %v341_v45 }
  0xc8   :  { %v278_v46 = vadd.f32 %v542_v42, %v277_v43  ;;  %v279_v47 = vmul.f32 %v277_v43, %v277_v43 }
  0xc9   :  { %v344_v63 = vadd.f32 %v343_v54, %v342_v53  ;;  %v345_v5 = vmul.f32 %v343_v54, %v343_v54 }
  0xca   :  { %v544_v48 = vpop.eup %543  ;;  %v280_v49 = vadd.f32 %v279_v47, %v278_v46  ;;  %v281_v50 = vmul.f32 %v279_v47, %v279_v47 }
  0xcb   :  { %v384_v51 = vmul.f32 %v544_v48, %v544_v48  ;;  %v346_v10 = vadd.f32 %v345_v5, %v344_v63 }
  0xcc   :  { %v546_v52 = vpop.eup %545  ;;  %v282_v55 = vadd.f32 %v281_v50, %v280_v49  ;;  %v283_v56 = vmul.f32 %v281_v50, %v281_v50 }
  0xcd   :  { %v385_v57 = vadd.f32 %v544_v48, %v384_v51  ;;  %v386_v58 = vmul.f32 %v384_v51, %v384_v51  ;;  %v429_v59 = vmul.f32 %v546_v52, %v546_v52  ;;  %v347_v13 = vsel %vm285_vm1, %v346_v10, 0.0 }
  0xce   :  { %v284_v60 = vadd.f32 %v283_v56, %v282_v55 }
  0xcf   :  { %v387_v61 = vadd.f32 %v386_v58, %v385_v57  ;;  %v388_v62 = vmul.f32 %v386_v58, %v386_v58  ;;  %v430_v0 = vadd.f32 %v546_v52, %v429_v59  ;;  %v431_v1 = vmul.f32 %v429_v59, %v429_v59 }
  0xd0   :  { %v286_v2 = vsel %vm285_vm1, %v284_v60, 0.0 }
  0xd1   :  { %v389_v3 = vadd.f32 %v388_v62, %v387_v61  ;;  %v390_v4 = vmul.f32 %v388_v62, %v388_v62  ;;  %287 = vadd.xlane.f32.xlu1 %v286_v2  ;;  %v432_v6 = vadd.f32 %v431_v1, %v430_v0  ;;  %v433_v7 = vmul.f32 %v431_v1, %v431_v1 }
  0xd3   :  { %v391_v8 = vadd.f32 %v390_v4, %v389_v3  ;;  %v434_v11 = vadd.f32 %v433_v7, %v432_v6  ;;  %v435_v12 = vmul.f32 %v433_v7, %v433_v7 }
  0xd5   :  { %v392_v9 = vsel %vm285_vm1, %v391_v8, 0.0  ;;  %v436_v14 = vadd.f32 %v435_v12, %v434_v11 }
  0xd6   :  { %393 = vadd.xlane.f32.xlu2 %v392_v9 }
  0xd7   :  { %v437_v15 = vsel %vm285_vm1, %v436_v14, 0.0 }
  0xd9   :  { %348 = vadd.xlane.f32.xlu1 %v347_v13 }
  0xde   :  { %438 = vadd.xlane.f32.xlu2 %v437_v15 }
 0x144   :  { %v288_v16 = vpop.xlane.xlu1 %287 }
 0x145   :  { %v289_v17 = vrot.slane %v288_v16, 4 }
 0x147   :  { %v290_v18 = vadd.f32 %v289_v17, %v288_v16 }
 0x149   :  { %v394_v19 = vpop.xlane.xlu2 %393  ;;  %v291_v20 = vrot.slane %v290_v18, 2 }
 0x14a   :  { %v395_v21 = vrot.slane %v394_v19, 4 }
 0x14b   :  { %v292_v23 = vadd.f32 %v291_v20, %v290_v18 }
 0x14c   :  { %v396_v22 = vadd.f32 %v395_v21, %v394_v19  ;;  %v349_v24 = vpop.xlane.xlu1 %348 }
 0x14d   :  { %v350_v26 = vrot.slane %v349_v24, 4  ;;  %v293_v27 = vrot.slane %v292_v23, 1 }
 0x14e   :  { %v397_v25 = vrot.slane %v396_v22, 2 }
 0x14f   :  { %v351_v28 = vadd.f32 %v350_v26, %v349_v24  ;;  %v294_v29 = vadd.f32 %v293_v27, %v292_v23 }
 0x150   :  { %v398_v31 = vadd.f32 %v397_v25, %v396_v22 }
 0x151   :  { %v439_v30 = vpop.xlane.xlu2 %438  ;;  %v352_v32 = vrot.slane %v351_v28, 2  ;;  %523 = vpush %v294_v29 }
 0x152   :  { %v440_v33 = vrot.slane %v439_v30, 4  ;;  %v399_v36 = vrot.slane %v398_v31, 1 }
 0x153   :  { %v353_v34 = vadd.f32 %v352_v32, %v351_v28 }
 0x154   :  { %v441_v35 = vadd.f32 %v440_v33, %v439_v30  ;;  %v400_v41 = vadd.f32 %v399_v36, %v398_v31 }
 0x155   :  { %v354_v38 = vrot.slane %v353_v34, 1 }
 0x156   :  { %v442_v37 = vrot.slane %v441_v35, 2 }
 0x157   :  { %v355_v40 = vadd.f32 %v354_v38, %v353_v34 }
 0x158   :  { %v443_v39 = vadd.f32 %v442_v37, %v441_v35 }
 0x159   :  { %525 = vpush %v355_v40 }
 0x15a   :  { %v444_v42 = vrot.slane %v443_v39, 1  ;;  %527 = vpush %v400_v41 }
 0x15c   :  { %v445_v43 = vadd.f32 %v444_v42, %v443_v39 }
 0x15e   :  { %529 = vpush %v445_v43 }
 0x182   :  { %s524_s1 = spop %523 }
 0x18a   :  { %s526_s8 = spop %525 }
 0x18b   :  { %s528_s24 = spop %527  ;;  %s447_s4 = sadd.f32 %s526_s8, %s524_s1 }
 0x18f   :  { %s530_s20 = spop %529 }
 0x190   :  { %s448_s5 = sadd.f32 %s530_s20, %s528_s24 }
 0x192   :  { %s449_s29 = ssub.f32 %s447_s4, %s448_s5 }
 0x194   :  { %v450_v44 = vstv %s449_s29 }
 0x195   :  { %452 = vst.msk [vmem:[#allocation10] sm:$0x1] %vm451_vm2, %v450_v44 }
 0x196   :  { %463 = dma.vmem_to_hbm [thread:$0]  %s459_s26, 16, %s461_s28, [#allocation7]  }
 0x197   :  { %637 = dma.done.wait [#allocation7], 16  }
 0x198   :  { %638 = vsyncadd [#allocation7], 4294967280 }
 0x199   :  { %468 = vsyncpa [#allocation6], 1 }
 0x19a   :  { %469 = vsyncpa [#allocation9], 1 }
 0x19b   :  { %470 = vsyncpa [#allocation7], 1 }

</bundles_post_ra>
